<compile_context>
chip_gen: v5e
topology: v5e:2x2
jax: 0.10.0
libtpu: 0.0.40
codegen_flags: <defaults>
</compile_context>

<pallas_src>
import jax
import jax.numpy as jnp
from jax.experimental import pallas as pl
from jax.experimental.pallas import tpu as pltpu


def policy_fwd_kernel(state_ref, w1_ref, b1_ref, w2_ref, b2_ref, out_ref):
    # state_ref: (TB, n_states) bf16        w1_ref: (n_states, n_hidden) bf16
    # b1_ref:    (1, n_hidden) f32          w2_ref: (n_hidden, Np) bf16 (Np = padded actions)
    # b2_ref:    (1, Np) f32 (-1e30 in padded columns)
    # out_ref:   (TB, Np) f32
    x = state_ref[...]

    # fc1 + relu (bf16 inputs, f32 MXU accumulation)
    h = jnp.dot(x, w1_ref[...], preferred_element_type=jnp.float32) + b1_ref[...]
    h = jnp.maximum(h, 0.0).astype(jnp.bfloat16)

    # fc2 over the lane-dense padded action axis
    logits = jnp.dot(h, w2_ref[...], preferred_element_type=jnp.float32) + b2_ref[...]

    # Numerically stable log_softmax over dim=1. Padded columns sit at ~-1e30, so they
    # never set the max and exp() underflows to exactly 0 in the sum.
    z = logits - jnp.max(logits, axis=1, keepdims=True)
    lse = jnp.log(jnp.sum(jnp.exp(z), axis=1, keepdims=True))
    out_ref[...] = (z - lse).astype(out_ref.dtype)


def _round_up(x, m):
    return ((x + m - 1) // m) * m


def policy_forward(state, w1, b1, w2, b2, *, tile_batch=None):
    """state: (B, n_states) f32; w1: (n_states, n_hidden); b1: (n_hidden,);
    w2: (n_hidden, n_actions); b2: (n_actions,).  Returns (B, n_actions) f32 log-probs.

    Weights are stored pre-transposed as (in, out) == PyTorch weight.T, so the kernel
    computes state @ W1 + b1 and h @ W2 + b2 directly on the MXU.
    """
    B, n_states = state.shape
    n_hidden = w1.shape[1]
    n_actions = w2.shape[1]

    # Large batch tiles: one grid step for small B; cap at 1024 rows so big rollout
    # batches still produce >=2 tiles (v7x megacore sharding via "parallel").
    if tile_batch is None:
        tile_batch = min(_round_up(B, 16), 1024)
    else:
        tile_batch = _round_up(tile_batch, 16)
    Bp = _round_up(B, tile_batch)

    # Pad the batch (extra rows are sliced off; zeros flow harmlessly through the net).
    if Bp != B:
        state = jnp.pad(state, ((0, Bp - B), (0, 0)))
    state_bf16 = state.astype(jnp.bfloat16)

    # Lane-dense action axis: pad to a multiple of 128 with zero weights / -1e30 bias.
    Np = 128 * pl.cdiv(n_actions, 128)
    w1_bf16 = w1.astype(jnp.bfloat16)
    w2p = jnp.zeros((n_hidden, Np), jnp.bfloat16).at[:, :n_actions].set(
        w2.astype(jnp.bfloat16))
    b1_2d = b1.reshape(1, n_hidden).astype(jnp.float32)
    b2p = jnp.full((1, Np), -1e30, jnp.float32).at[0, :n_actions].set(
        b2.astype(jnp.float32))

    grid = (Bp // tile_batch,)
    out_padded = pl.pallas_call(
        policy_fwd_kernel,
        out_shape=jax.ShapeDtypeStruct((Bp, Np), jnp.float32),
        grid_spec=pltpu.PrefetchScalarGridSpec(
            num_scalar_prefetch=0,
            grid=grid,
            in_specs=[
                pl.BlockSpec((tile_batch, n_states), lambda i: (i, 0)),  # streamed
                pl.BlockSpec((n_states, n_hidden), lambda i: (0, 0)),    # resident
                pl.BlockSpec((1, n_hidden), lambda i: (0, 0)),
                pl.BlockSpec((n_hidden, Np), lambda i: (0, 0)),
                pl.BlockSpec((1, Np), lambda i: (0, 0)),
            ],
            out_specs=pl.BlockSpec((tile_batch, Np), lambda i: (i, 0)),
        ),
        compiler_params=pltpu.CompilerParams(
            dimension_semantics=("parallel",),
        ),
    )(state_bf16, w1_bf16, b1_2d, w2p, b2p)

    return out_padded[:B, :n_actions]


def init_params(key, n_states, n_hidden, n_actions):
    """Deterministic init matching nn.Linear's U(-1/sqrt(fan_in), 1/sqrt(fan_in))."""
    k1, k2, k3, k4 = jax.random.split(key, 4)
    bound1 = 1.0 / jnp.sqrt(jnp.float32(n_states))
    bound2 = 1.0 / jnp.sqrt(jnp.float32(n_hidden))
    # stored as (in, out) == PyTorch weight.T
    w1 = jax.random.uniform(k1, (n_states, n_hidden), jnp.float32, -bound1, bound1)
    b1 = jax.random.uniform(k2, (n_hidden,), jnp.float32, -bound1, bound1)
    w2 = jax.random.uniform(k3, (n_hidden, n_actions), jnp.float32, -bound2, bound2)
    b2 = jax.random.uniform(k4, (n_actions,), jnp.float32, -bound2, bound2)
    return w1, b1, w2, b2


if __name__ == "__main__":
    # Small shapes consistent with the module's forward:
    # state (batch, n_states); in PolicyNetwork.hidden, n_states = 2 * code_width.
    batch, n_states, n_hidden, n_actions = 16, 32, 32, 3

    key = jax.random.PRNGKey(0)
    kp, ks = jax.random.split(key)
    w1, b1, w2, b2 = init_params(kp, n_states, n_hidden, n_actions)
    state = jax.random.normal(ks, (batch, n_states), jnp.float32)

    log_probs = policy_forward(state, w1, b1, w2, b2)
    log_probs = jax.block_until_ready(log_probs)
    assert log_probs.shape == (batch, n_actions)

    # Reference 1: mirror the kernel's bf16 rounding of inputs/weights/activations
    # (products are exact in f32, accumulation is f32) -> tight tolerance.
    def bf16_round(x):
        return x.astype(jnp.bfloat16).astype(jnp.float32)

    xb, w1b, w2b = bf16_round(state), bf16_round(w1), bf16_round(w2)
    h_ref = jnp.maximum(xb @ w1b + b1, 0.0)
    logits_ref = bf16_round(h_ref) @ w2b + b2
    ref_bf16 = jax.nn.log_softmax(logits_ref, axis=1)
    assert jnp.max(jnp.abs(log_probs - ref_bf16)) < 1e-3

    # Reference 2: exact f32 forward semantics of the PyTorch module (loose tolerance
    # only to absorb the intentional bf16 quantization of the MXU path).
    ref_f32 = jax.nn.log_softmax(jnp.maximum(state @ w1 + b1, 0.0) @ w2 + b2, axis=1)
    assert jnp.max(jnp.abs(log_probs - ref_f32)) < 5e-2

    print("KERNEL_OK")
</pallas_src>

<mosaic_0001>
module attributes {stable_mosaic.version = 11 : i64} {
  func.func @policy_fwd_kernel(%arg0: i32, %arg1: memref<16x32xbf16, #tpu.memory_space<vmem>>, %arg2: memref<32x32xbf16, #tpu.memory_space<vmem>>, %arg3: memref<1x32xf32, #tpu.memory_space<vmem>>, %arg4: memref<32x128xbf16, #tpu.memory_space<vmem>>, %arg5: memref<1x128xf32, #tpu.memory_space<vmem>>, %arg6: memref<16x128xf32, #tpu.memory_space<vmem>>) attributes {dimension_semantics = [#tpu.dimension_semantics<parallel>], iteration_bounds = array<i64: 1>, scalar_prefetch = 0 : i64, scratch_operands = 0 : i64, tpu.core_type = #tpu.core_type<tc>, window_params = [{transform_indices = @transform_0, window_bounds = array<i64: 16, 32>}, {pipeline_mode = #tpu.pipeline_mode<synchronous>, transform_indices = @transform_1, window_bounds = array<i64: 32, 32>}, {pipeline_mode = #tpu.pipeline_mode<synchronous>, transform_indices = @transform_2, window_bounds = array<i64: 1, 32>}, {pipeline_mode = #tpu.pipeline_mode<synchronous>, transform_indices = @transform_3, window_bounds = array<i64: 32, 128>}, {pipeline_mode = #tpu.pipeline_mode<synchronous>, transform_indices = @transform_4, window_bounds = array<i64: 1, 128>}, {transform_indices = @transform_5, window_bounds = array<i64: 16, 128>}]} {
    %c0 = arith.constant 0 : index
    %c0_0 = arith.constant 0 : index
    %0 = vector.load %arg1[%c0, %c0_0] : memref<16x32xbf16, #tpu.memory_space<vmem>>, vector<16x32xbf16>
    %c0_1 = arith.constant 0 : index
    %c0_2 = arith.constant 0 : index
    %1 = vector.load %arg2[%c0_1, %c0_2] : memref<32x32xbf16, #tpu.memory_space<vmem>>, vector<32x32xbf16>
    %cst = arith.constant dense<0.000000e+00> : vector<16x32xf32>
    %2 = tpu.matmul %0, %1, %cst {dimension_numbers = #tpu.dot_dimension_numbers<[1], [0], [0], [1], [0, 0, 1, 1], [], []>} : vector<16x32xbf16>, vector<32x32xbf16>, vector<16x32xf32> -> vector<16x32xf32>
    %c0_3 = arith.constant 0 : index
    %c0_4 = arith.constant 0 : index
    %3 = vector.load %arg3[%c0_3, %c0_4] : memref<1x32xf32, #tpu.memory_space<vmem>>, vector<1x32xf32>
    %4 = vector.broadcast %3 : vector<1x32xf32> to vector<16x32xf32>
    %5 = arith.addf %2, %4 : vector<16x32xf32>
    %cst_5 = arith.constant 0.000000e+00 : f32
    %6 = vector.broadcast %cst_5 : f32 to vector<16x32xf32>
    %7 = arith.maximumf %5, %6 : vector<16x32xf32>
    %8 = arith.truncf %7 : vector<16x32xf32> to vector<16x32xbf16>
    %c0_6 = arith.constant 0 : index
    %c0_7 = arith.constant 0 : index
    %9 = vector.load %arg4[%c0_6, %c0_7] : memref<32x128xbf16, #tpu.memory_space<vmem>>, vector<32x128xbf16>
    %cst_8 = arith.constant dense<0.000000e+00> : vector<16x128xf32>
    %10 = tpu.matmul %8, %9, %cst_8 {dimension_numbers = #tpu.dot_dimension_numbers<[1], [0], [0], [1], [0, 0, 1, 1], [], []>} : vector<16x32xbf16>, vector<32x128xbf16>, vector<16x128xf32> -> vector<16x128xf32>
    %c0_9 = arith.constant 0 : index
    %c0_10 = arith.constant 0 : index
    %11 = vector.load %arg5[%c0_9, %c0_10] : memref<1x128xf32, #tpu.memory_space<vmem>>, vector<1x128xf32>
    %12 = vector.broadcast %11 : vector<1x128xf32> to vector<16x128xf32>
    %13 = arith.addf %10, %12 : vector<16x128xf32>
    %cst_11 = arith.constant dense<0xFF800000> : vector<16xf32>
    %14 = vector.multi_reduction <maximumf>, %13, %cst_11 [1] : vector<16x128xf32> to vector<16xf32>
    %15 = vector.shape_cast %14 : vector<16xf32> to vector<16x1xf32>
    %16 = vector.broadcast %15 : vector<16x1xf32> to vector<16x128xf32>
    %17 = arith.subf %13, %16 : vector<16x128xf32>
    %18 = math.exp %17 : vector<16x128xf32>
    %cst_12 = arith.constant dense<0.000000e+00> : vector<16xf32>
    %19 = vector.multi_reduction <add>, %18, %cst_12 [1] : vector<16x128xf32> to vector<16xf32>
    %20 = vector.shape_cast %19 : vector<16xf32> to vector<16x1xf32>
    %21 = math.log %20 : vector<16x1xf32>
    %22 = vector.broadcast %21 : vector<16x1xf32> to vector<16x128xf32>
    %23 = arith.subf %17, %22 : vector<16x128xf32>
    %c0_13 = arith.constant 0 : index
    %c0_14 = arith.constant 0 : index
    %24 = vector.load %arg6[%c0_13, %c0_14] : memref<16x128xf32, #tpu.memory_space<vmem>>, vector<16x128xf32>
    tpu.vector_store %arg6[%c0_13, %c0_14], %23 {strides = array<i32>} : memref<16x128xf32, #tpu.memory_space<vmem>>, vector<16x128xf32>,
    return
  }
  func.func @transform_0(%arg0: i32) -> (i32, i32) {
    %c0_i32 = arith.constant 0 : i32
    %c0_i32_0 = arith.constant 0 : i32
    return %arg0, %c0_i32 : i32, i32
  }
  func.func @transform_1(%arg0: i32) -> (i32, i32) {
    %c0_i32 = arith.constant 0 : i32
    %c0_i32_0 = arith.constant 0 : i32
    %c0_i32_1 = arith.constant 0 : i32
    return %c0_i32, %c0_i32_0 : i32, i32
  }
  func.func @transform_2(%arg0: i32) -> (i32, i32) {
    %c0_i32 = arith.constant 0 : i32
    %c0_i32_0 = arith.constant 0 : i32
    %c0_i32_1 = arith.constant 0 : i32
    return %c0_i32, %c0_i32_0 : i32, i32
  }
  func.func @transform_3(%arg0: i32) -> (i32, i32) {
    %c0_i32 = arith.constant 0 : i32
    %c0_i32_0 = arith.constant 0 : i32
    %c0_i32_1 = arith.constant 0 : i32
    return %c0_i32, %c0_i32_0 : i32, i32
  }
  func.func @transform_4(%arg0: i32) -> (i32, i32) {
    %c0_i32 = arith.constant 0 : i32
    %c0_i32_0 = arith.constant 0 : i32
    %c0_i32_1 = arith.constant 0 : i32
    return %c0_i32, %c0_i32_0 : i32, i32
  }
  func.func @transform_5(%arg0: i32) -> (i32, i32) {
    %c0_i32 = arith.constant 0 : i32
    %c0_i32_0 = arith.constant 0 : i32
    return %arg0, %c0_i32 : i32, i32
  }
}

</mosaic_0001>

<bundles_post_ra>
// kernel: tpu_custom_call.1
= control target key start
LH: loop header
LB: loop body
LE: loop exit
PB: predicated region body
PF: predicated region fallthrough
CT: control target
= control target key end

     0   :  { %10 = vsyncpa [#allocation3], 0  ;;  %s399_s0 = inlined_call_operand.hbm [shape: bf16[16,32], index: 0, kind: input, shape index: {}]   ;;  %s400_s1 = inlined_call_operand.hbm [shape: bf16[32,32], index: 1, kind: input, shape index: {}]   ;;  %s401_s2 = inlined_call_operand.vmem [shape: f32[1,32], index: 2, kind: input, shape index: {}]   ;;  %s402_s3 = inlined_call_operand.hbm [shape: bf16[32,128], index: 3, kind: input, shape index: {}]   ;;  %s403_s4 = inlined_call_operand.vmem [shape: f32[1,128], index: 4, kind: input, shape index: {}]   ;;  %s404_s5 = inlined_call_operand.hbm [shape: f32[16,128], index: 5, kind: output, shape index: {}]  }
   0x1   :  { %11 = vsyncpa [#allocation6], 0 }
   0x2   :  { %12 = vsyncpa [#allocation4], 0  ;;  %s30_s20 = sshll.u32 %s400_s1, 4  ;;  %s343_s21 = smov [#allocation5]   ;;  %s31_s20 = int_to_ptr.hbm [resolvable:$true] %s30_s20 }
   0x3   :  { %s32_s22 = sshll.u32 %s343_s21, 4  ;;  %s17_s25 = sshll.u32 %s399_s0, 4  ;;  %s33_s22 = int_to_ptr.vmem [resolvable:$true] %s32_s22  ;;  %s18_s25 = int_to_ptr.hbm [resolvable:$true] %s17_s25 }
   0x4   :  { %s344_s26 = smov 64   ;;  %s345_s27 = smov 4  }
   0x5   :  { %38 = dma.hbm_to_vmem [thread:$0]  %s31_s20, 256, %s33_s22, [#allocation6], %s344_s26, %s344_s26, %s345_s27  }
   0x6   :  { %s346_s28 = smov [#allocation2]   ;;  %s45_s7 = sshll.u32 %s402_s3, 4  ;;  %s46_s7 = int_to_ptr.hbm [resolvable:$true] %s45_s7 }
   0x7   :  { %s19_s29 = sshll.u32 %s346_s28, 4  ;;  %s347_s1 = smov [#allocation7]   ;;  %s20_s29 = int_to_ptr.vmem [resolvable:$true] %s19_s29 }
   0x8   :  { %25 = dma.hbm_to_vmem [thread:$0]  %s18_s25, 128, %s20_s29, [#allocation3], %s344_s26, %s344_s26, %s345_s27  }
   0x9   :  { %s47_s8 = sshll.u32 %s347_s1, 4  ;;  %s48_s8 = int_to_ptr.vmem [resolvable:$true] %s47_s8 }
   0xa   :  { %53 = dma.hbm_to_vmem [thread:$0]  %s46_s7, 256, %s48_s8, [#allocation6], %s344_s26, %s344_s26, %s345_s27  }
   0xb   :  { %337 = dma.done.wait [#allocation3], 128  }
   0xc   :  { %338 = vsyncadd [#allocation3], 4294967168 }
   0xd   :  { %339 = dma.done.wait [#allocation6], 512  }
   0xe   :  { %340 = vsyncadd [#allocation6], 4294966784  ;;  %v220_v0 = vld [vmem:[#allocation5 + $0x8] sm:$0xff]  ;;  %v219_v1 = vld [vmem:[#allocation5] sm:$0xff]  ;;  %vm96_vm0 = vcmask 261120   ;;  %s182_s13 = sshll.u32 %s404_s5, 4  ;;  %s183_s13 = int_to_ptr.hbm [resolvable:$true] %s182_s13 }
   0xf   :  { %106 = vmatpush.bf16.msra.mxu0 %v220_v0  ;;  %v218_v2 = vld [vmem:[#allocation2] sm:$0xff]  ;;  %v221_v4 = vld [vmem:[#allocation7] sm:$0xff]  ;;  %s349_s14 = smov 128   ;;  %s350_s15 = smov 8  }
  0x10   :  { %v222_v3 = vld [vmem:[#allocation7 + $0x8] sm:$0xff] }
  0x11   :  { %146 = vmatpush.bf16.msra.mxu1 %v222_v3  ;;  %v231_v6 = vld [vmem:[%s401_s2] ss:$0 sm:$0xff]  ;;  %s348_s2 = smov [#allocation8]  }
  0x12   :  { %v232_v13 = vld [vmem:[%s403_s4] ss:$0 sm:$0xff]  ;;  %s180_s4 = sshll.u32 %s348_s2, 4  ;;  %s181_s4 = int_to_ptr.vmem [resolvable:$true] %s180_s4 }
  0x13   :  { %107 = vmatpush.bf16.msra.mxu0 %v219_v1 }
  0x15   :  { %147 = vmatpush.bf16.msra.mxu1 %v221_v4 }
  0x16   :  { %208 = vmatmul.msk.bf16.vlgmr.msra.gmra.mxu0 %vm96_vm0, %v218_v2 }
  0x93   :  { %v109_v5 = vpop.f32.mrf.mxu0 }
  0x94   :  { %v110_v7 = vadd.f32 %v231_v6, %v109_v5 }
  0x96   :  { %v114_v10 = vmax.f32 %v110_v7, 0.0 }
  0x9b   :  { %v111_v8 = vpop.f32.mrf.mxu0 }
  0x9c   :  { %v112_v9 = vadd.f32 %v231_v6, %v111_v8 }
  0x9e   :  { %v115_v11 = vmax.f32 %v112_v9, 0.0 }
  0xa0   :  { %v116_v12 = vpack.c.bf16 %v115_v11, %v114_v10 }
  0xa2   :  { %217 = vmatmul.msk.bf16.vlgmr.msra.gmra.mxu1 %vm96_vm0, %v116_v12 }
 0x11f   :  { %v149_v14 = vpop.f32.mrf.mxu1 }
 0x120   :  { %v150_v15 = vadd.f32 %v232_v13, %v149_v14 }
 0x122   :  { %154 = vmax.xlane.f32.xlu0 %v150_v15 }
 0x127   :  { %v151_v16 = vpop.f32.mrf.mxu1 }
 0x128   :  { %v152_v17 = vadd.f32 %v232_v13, %v151_v16 }
 0x12a   :  { %156 = vmax.xlane.f32.xlu0 %v152_v17 }
 0x195   :  { %v155_v18 = vpop.xlane.xlu0 %154 }
 0x196   :  { %v158_v19 = vsub.f32 %v150_v15, %v155_v18 }
 0x198   :  { %v160_v20 = vmul.f32 1.442695, %v158_v19 }
 0x19a   :  { %233 = vpow2.f32 %v160_v20 }
 0x19d   :  { %v157_v21 = vpop.xlane.xlu0 %156 }
 0x19e   :  { %v159_v22 = vsub.f32 %v152_v17, %v157_v21 }
 0x1a0   :  { %v234_v23 = vpop.eup %233  ;;  %v162_v24 = vmul.f32 1.442695, %v159_v22 }
 0x1a1   :  { %164 = vadd.xlane.f32.xlu1 %v234_v23 }
 0x1a2   :  { %235 = vpow2.f32 %v162_v24 }
 0x1a8   :  { %v236_v25 = vpop.eup %235 }
 0x1a9   :  { %166 = vadd.xlane.f32.xlu1 %v236_v25 }
 0x214   :  { %v165_v26 = vpop.xlane.xlu1 %164 }
 0x215   :  { %237 = vlog2.f32 %v165_v26 }
 0x21b   :  { %v238_v27 = vpop.eup %237 }
 0x21c   :  { %v169_v28 = vmul.f32 0.6931472, %v238_v27  ;;  %v167_v29 = vpop.xlane.xlu1 %166 }
 0x21d   :  { %239 = vlog2.f32 %v167_v29 }
 0x21e   :  { %v172_v30 = vsub.f32 %v158_v19, %v169_v28 }
 0x220   :  { %174 = vst [vmem:[#allocation8] sm:$0xff] %v172_v30 }
 0x223   :  { %v240_v31 = vpop.eup %239 }
 0x224   :  { %v171_v32 = vmul.f32 0.6931472, %v240_v31 }
 0x226   :  { %v173_v33 = vsub.f32 %v159_v22, %v171_v32 }
 0x228   :  { %175 = vst [vmem:[#allocation8 + $0x8] sm:$0xff] %v173_v33 }
 0x229   :  { %188 = dma.vmem_to_hbm [thread:$0]  %s181_s4, 256, %s183_s13, [#allocation4], %s349_s14, %s349_s14, %s350_s15  }
 0x22a   :  { %341 = dma.done.wait [#allocation4], 256  }
 0x22b   :  { %342 = vsyncadd [#allocation4], 4294967040 }
 0x22c   :  { %193 = vsyncpa [#allocation3], 1 }
 0x22d   :  { %194 = vsyncpa [#allocation6], 1 }
 0x22e   :  { %195 = vsyncpa [#allocation4], 1 }

</bundles_post_ra>
